<compile_context>
chip_gen: v5e
topology: v5e:2x2
jax: 0.10.0
libtpu: 0.0.40
codegen_flags: <defaults>
</compile_context>

<pallas_src>
import functools

import jax
import jax.numpy as jnp
from jax.experimental import pallas as pl
from jax.experimental.pallas import tpu as pltpu

_LANE = 128


def _dice_partial_kernel(pred_ref, lab_ref, out_ref, *, num_classes, rows_total,
                         rows_per_step, tiles_per_chunk, need_mask):
    """Accumulate per-class lane-partial sums for one (batch, chunk).

    pred_ref: (C, TR, 128)   native dtype (cast to f32 per (TR,128) slice)
    lab_ref : (TR, 128)      integer labels in their native dtype
    out_ref : (3, C, 128)    f32, resident across the reduction (j) axis:
              row 0 = sum(onehot * pred), row 1 = sum(onehot), row 2 = sum(pred^2)
    """
    j = pl.program_id(2)

    @pl.when(j == 0)
    def _():
        out_ref[...] = jnp.zeros_like(out_ref)

    lab = lab_ref[...]                                       # (TR, 128)

    if need_mask:
        # Only the globally-last row tile can be partial; mask its OOB rows.
        g = pl.program_id(1) * tiles_per_chunk + j           # global tile index
        remaining = rows_total - g * rows_per_step
        row_valid = (
            jax.lax.broadcasted_iota(jnp.int32, (rows_per_step, _LANE), 0)
            < remaining)

    inter_rows, cnt_rows, sq_rows = [], [], []
    for c in range(num_classes):                             # static C=4 loop
        p = pred_ref[c].astype(jnp.float32)                  # (TR, 128)
        m = lab == c
        if need_mask:
            p = jnp.where(row_valid, p, 0.0)                 # kill garbage rows
            m = jnp.logical_and(m, row_valid)
        inter_rows.append(jnp.sum(jnp.where(m, p, 0.0), axis=0, keepdims=True))
        cnt_rows.append(jnp.sum(jnp.where(m, 1.0, 0.0), axis=0, keepdims=True))
        sq_rows.append(jnp.sum(p * p, axis=0, keepdims=True))

    update = jnp.stack(
        [jnp.concatenate(inter_rows, axis=0),
         jnp.concatenate(cnt_rows, axis=0),
         jnp.concatenate(sq_rows, axis=0)], axis=0)          # (3, C, 128)
    out_ref[...] += update                                   # single block RMW


def _default_rows_per_tile():
    # v7x (64 MiB VMEM, ~3.2 TB/s HBM) needs bigger tiles to amortize the
    # ~0.35 us per-step overhead; v5e/v6e are near roofline at 1024 rows.
    try:
        vmem_bytes = pltpu.get_tpu_info().vmem_capacity_bytes
    except Exception:
        return 1024
    return 2048 if vmem_bytes <= (64 << 20) else 1024


def dice_loss_e1d3(y_pred, y_true, *, num_classes=4, eps=1e-7, rows_per_tile=None):
    """y_pred: (B, C, H, W) float (any float dtype), y_true: (B, H, W) integer."""
    B, C, H, W = y_pred.shape
    assert C == num_classes, "channel dim must equal num_classes"
    N = H * W

    if rows_per_tile is None:
        rows_per_tile = _default_rows_per_tile()

    # Free reshapes; keep native dtypes (no host upcast / transpose).
    pred = y_pred.reshape(B, C, N)
    lab = y_true.reshape(B, N)
    if not jnp.issubdtype(lab.dtype, jnp.integer) or lab.dtype.itemsize > 4:
        lab = lab.astype(jnp.int32)

    # Pad only to the unavoidable 128-lane boundary (skipped when aligned).
    rows = pl.cdiv(N, _LANE)
    lane_pad = rows * _LANE - N
    if lane_pad:
        # pred padded with 0 -> contributes nothing to sum(pred^2);
        # labels padded with num_classes -> never match any class.
        pred = jnp.pad(pred, ((0, 0), (0, 0), (0, lane_pad)))
        lab = jnp.pad(lab, ((0, 0), (0, lane_pad)), constant_values=num_classes)
    pred = pred.reshape(B, C, rows, _LANE)
    lab = lab.reshape(B, rows, _LANE)

    # Sublane alignment required by the narrowest streamed dtype
    # (f32 -> 8, bf16 -> 16, int8 -> 32); full-extent single tiles are exempt.
    align = max(8, 32 // pred.dtype.itemsize, 32 // lab.dtype.itemsize)
    if rows <= rows_per_tile:
        tr = rows
    else:
        tr = ((rows_per_tile + align - 1) // align) * align
    n_tiles = pl.cdiv(rows, tr)
    need_mask = (rows % tr) != 0          # in-kernel tail masking, no host pad

    # B == 1: split spatial tiles into 2 parallel super-chunks (uses both v7x
    # TensorCores; harmless on single-TC v5e/v6e).
    num_chunks = 2 if (B == 1 and n_tiles >= 2 and n_tiles % 2 == 0) else 1
    tiles_per_chunk = n_tiles // num_chunks

    blk_bytes = (C * tr * _LANE * pred.dtype.itemsize
                 + tr * _LANE * lab.dtype.itemsize
                 + 3 * C * _LANE * 4)
    vmem_limit = int(min(max(32 * 1024 * 1024,
                             2 * blk_bytes + 6 * tr * _LANE * 4),
                         48 * 1024 * 1024))

    kernel = functools.partial(
        _dice_partial_kernel, num_classes=C, rows_total=rows,
        rows_per_step=tr, tiles_per_chunk=tiles_per_chunk, need_mask=need_mask)

    partials = pl.pallas_call(
        kernel,
        out_shape=jax.ShapeDtypeStruct((B, num_chunks, 3, C, _LANE), jnp.float32),
        grid_spec=pltpu.PrefetchScalarGridSpec(
            num_scalar_prefetch=0,
            grid=(B, num_chunks, tiles_per_chunk),
            in_specs=[
                pl.BlockSpec((None, C, tr, _LANE),
                             lambda b, s, j: (b, 0, s * tiles_per_chunk + j, 0)),
                pl.BlockSpec((None, tr, _LANE),
                             lambda b, s, j: (b, s * tiles_per_chunk + j, 0)),
            ],
            out_specs=pl.BlockSpec((None, None, 3, C, _LANE),
                                   lambda b, s, j: (b, s, 0, 0, 0)),
        ),
        compiler_params=pltpu.CompilerParams(
            dimension_semantics=("parallel", "parallel", "arbitrary"),
            vmem_limit_bytes=vmem_limit,
        ),
    )(pred, lab)

    # Tiny epilogue in plain JAX: reduce batch/chunk/lanes, apply eps and mean.
    totals = jnp.sum(partials, axis=(0, 1, 4))      # (3, C)
    num = 2.0 * totals[0] + eps
    den = totals[1] + totals[2] + eps
    return 1.0 - jnp.mean(num / den)


def _dice_loss_e1d3_ref(y_pred, y_true, num_classes=4, eps=1e-7):
    """Pure-JAX reference matching the PyTorch forward exactly."""
    oh = jax.nn.one_hot(y_true, num_classes, dtype=jnp.float32)      # (B,H,W,C)
    oh = jnp.transpose(oh, (0, 3, 1, 2))                             # (B,C,H,W)
    dims = (0, 2, 3)
    yp = y_pred.astype(jnp.float32)
    num = 2.0 * jnp.sum(oh * yp, axis=dims)
    den = jnp.sum(oh * oh, axis=dims) + jnp.sum(yp * yp, axis=dims)
    return 1.0 - jnp.mean((num + eps) / (den + eps))


def _check(y_pred, y_true, C, tol=1e-5, **kw):
    loss = jax.block_until_ready(dice_loss_e1d3(y_pred, y_true, num_classes=C, **kw))
    ref = _dice_loss_e1d3_ref(y_pred, y_true, num_classes=C)
    assert jnp.allclose(loss, ref, rtol=tol, atol=tol), (loss, ref)


if __name__ == "__main__":
    key = jax.random.PRNGKey(0)

    # 1) Primary small test: B=2, C=4, H=W=16 (single tile per batch element).
    k1, k2, key = jax.random.split(key, 3)
    B, C, H, W = 2, 4, 16, 16
    y_pred = jax.random.normal(k1, (B, C, H, W), dtype=jnp.float32)
    y_true = jax.random.randint(k2, (B, H, W), 0, C, dtype=jnp.int32)
    _check(y_pred, y_true, C)

    # 2) Multi-tile reduction path (rows=32, rows_per_tile=8 -> 4 j steps).
    k1, k2, key = jax.random.split(key, 3)
    B, H, W = 2, 64, 64
    y_pred = jax.random.normal(k1, (B, C, H, W), dtype=jnp.float32)
    y_true = jax.random.randint(k2, (B, H, W), 0, C, dtype=jnp.int32)
    _check(y_pred, y_true, C, rows_per_tile=8)

    # 3) Unaligned spatial size exercises the 128-lane padding path.
    k1, k2, key = jax.random.split(key, 3)
    B, H, W = 2, 20, 20
    y_pred = jax.random.normal(k1, (B, C, H, W), dtype=jnp.float32)
    y_true = jax.random.randint(k2, (B, H, W), 0, C, dtype=jnp.int32)
    _check(y_pred, y_true, C)

    # 4) In-kernel tail masking: rows=18, tr=8 -> partial last tile (2 rows).
    k1, k2, key = jax.random.split(key, 3)
    B, H, W = 2, 48, 48
    y_pred = jax.random.normal(k1, (B, C, H, W), dtype=jnp.float32)
    y_true = jax.random.randint(k2, (B, H, W), 0, C, dtype=jnp.int32)
    _check(y_pred, y_true, C, rows_per_tile=8)

    # 5) B == 1 super-chunk split (grid gets a parallel chunk axis of size 2).
    k1, k2, key = jax.random.split(key, 3)
    B, H, W = 1, 64, 64
    y_pred = jax.random.normal(k1, (B, C, H, W), dtype=jnp.float32)
    y_true = jax.random.randint(k2, (B, H, W), 0, C, dtype=jnp.int32)
    _check(y_pred, y_true, C, rows_per_tile=8)

    # 6) Narrow dtypes: bf16 predictions + int8 labels (no host upcast).
    k1, k2, key = jax.random.split(key, 3)
    B, H, W = 2, 32, 32
    y_pred = jax.random.normal(k1, (B, C, H, W), dtype=jnp.float32).astype(jnp.bfloat16)
    y_true = jax.random.randint(k2, (B, H, W), 0, C, dtype=jnp.int32).astype(jnp.int8)
    _check(y_pred, y_true, C, tol=1e-3)

    print("KERNEL_OK")
</pallas_src>

<mosaic_0001>
module attributes {stable_mosaic.version = 11 : i64} {
  func.func @_dice_partial_kernel(%arg0: i32, %arg1: i32, %arg2: i32, %arg3: memref<1x4x2x128xf32, #tpu.memory_space<vmem>>, %arg4: memref<1x2x128xi32, #tpu.memory_space<vmem>>, %arg5: memref<1x1x3x4x128xf32, #tpu.memory_space<vmem>>) attributes {dimension_semantics = [#tpu.dimension_semantics<parallel>, #tpu.dimension_semantics<parallel>, #tpu.dimension_semantics<arbitrary>], iteration_bounds = array<i64: 2, 1, 1>, scalar_prefetch = 0 : i64, scratch_operands = 0 : i64, tpu.core_type = #tpu.core_type<tc>, window_params = [{transform_indices = @transform_0, window_bounds = array<i64: 1, 4, 2, 128>}, {transform_indices = @transform_1, window_bounds = array<i64: 1, 2, 128>}, {transform_indices = @transform_2, window_bounds = array<i64: 1, 1, 3, 4, 128>}]} {
    %c0_i32 = arith.constant 0 : i32
    %0 = arith.cmpi eq, %arg2, %c0_i32 : i32
    %1 = arith.extui %0 : i1 to i32
    %c0_i32_0 = arith.constant 0 : i32
    %2 = arith.cmpi ne, %1, %c0_i32_0 : i32
    scf.if %2 {
      %cst_50 = arith.constant 0.000000e+00 : f32
      %82 = vector.broadcast %cst_50 : f32 to vector<3x4x128xf32>
      %c0_51 = arith.constant 0 : index
      %c0_52 = arith.constant 0 : index
      %c0_53 = arith.constant 0 : index
      %c0_54 = arith.constant 0 : index
      %c0_55 = arith.constant 0 : index
      %83 = vector.load %arg5[%c0_51, %c0_52, %c0_53, %c0_54, %c0_55] : memref<1x1x3x4x128xf32, #tpu.memory_space<vmem>>, vector<1x1x3x4x128xf32>
      %84 = vector.shape_cast %83 : vector<1x1x3x4x128xf32> to vector<3x4x128xf32>
      %85 = vector.shape_cast %82 : vector<3x4x128xf32> to vector<1x1x3x4x128xf32>
      tpu.vector_store %arg5[%c0_51, %c0_52, %c0_53, %c0_54, %c0_55], %85 {strides = array<i32>} : memref<1x1x3x4x128xf32, #tpu.memory_space<vmem>>, vector<1x1x3x4x128xf32>,
    } else {
    }
    %c0 = arith.constant 0 : index
    %c0_1 = arith.constant 0 : index
    %c0_2 = arith.constant 0 : index
    %3 = vector.load %arg4[%c0, %c0_1, %c0_2] : memref<1x2x128xi32, #tpu.memory_space<vmem>>, vector<1x2x128xi32>
    %4 = vector.shape_cast %3 : vector<1x2x128xi32> to vector<2x128xi32>
    %c0_3 = arith.constant 0 : index
    %c0_4 = arith.constant 0 : index
    %c0_5 = arith.constant 0 : index
    %c0_6 = arith.constant 0 : index
    %5 = vector.load %arg3[%c0_3, %c0_4, %c0_5, %c0_6] : memref<1x4x2x128xf32, #tpu.memory_space<vmem>>, vector<1x1x2x128xf32>
    %6 = vector.shape_cast %5 : vector<1x1x2x128xf32> to vector<2x128xf32>
    %c0_i32_7 = arith.constant 0 : i32
    %7 = vector.broadcast %c0_i32_7 : i32 to vector<2x128xi32>
    %8 = arith.cmpi eq, %4, %7 : vector<2x128xi32>
    %cst = arith.constant 0.000000e+00 : f32
    %9 = vector.broadcast %cst : f32 to vector<2x128xf32>
    %10 = arith.select %8, %6, %9 : vector<2x128xi1>, vector<2x128xf32>
    %cst_8 = arith.constant dense<0.000000e+00> : vector<128xf32>
    %11 = vector.multi_reduction <add>, %10, %cst_8 [0] : vector<2x128xf32> to vector<128xf32>
    %12 = vector.shape_cast %11 : vector<128xf32> to vector<1x128xf32>
    %cst_9 = arith.constant 1.000000e+00 : f32
    %cst_10 = arith.constant 0.000000e+00 : f32
    %13 = vector.broadcast %cst_9 : f32 to vector<2x128xf32>
    %14 = vector.broadcast %cst_10 : f32 to vector<2x128xf32>
    %15 = arith.select %8, %13, %14 : vector<2x128xi1>, vector<2x128xf32>
    %cst_11 = arith.constant dense<0.000000e+00> : vector<128xf32>
    %16 = vector.multi_reduction <add>, %15, %cst_11 [0] : vector<2x128xf32> to vector<128xf32>
    %17 = vector.shape_cast %16 : vector<128xf32> to vector<1x128xf32>
    %18 = arith.mulf %6, %6 : vector<2x128xf32>
    %cst_12 = arith.constant dense<0.000000e+00> : vector<128xf32>
    %19 = vector.multi_reduction <add>, %18, %cst_12 [0] : vector<2x128xf32> to vector<128xf32>
    %20 = vector.shape_cast %19 : vector<128xf32> to vector<1x128xf32>
    %c0_13 = arith.constant 0 : index
    %c1 = arith.constant 1 : index
    %c0_14 = arith.constant 0 : index
    %c0_15 = arith.constant 0 : index
    %21 = vector.load %arg3[%c0_13, %c1, %c0_14, %c0_15] : memref<1x4x2x128xf32, #tpu.memory_space<vmem>>, vector<1x1x2x128xf32>
    %22 = vector.shape_cast %21 : vector<1x1x2x128xf32> to vector<2x128xf32>
    %c1_i32 = arith.constant 1 : i32
    %23 = vector.broadcast %c1_i32 : i32 to vector<2x128xi32>
    %24 = arith.cmpi eq, %4, %23 : vector<2x128xi32>
    %cst_16 = arith.constant 0.000000e+00 : f32
    %25 = vector.broadcast %cst_16 : f32 to vector<2x128xf32>
    %26 = arith.select %24, %22, %25 : vector<2x128xi1>, vector<2x128xf32>
    %cst_17 = arith.constant dense<0.000000e+00> : vector<128xf32>
    %27 = vector.multi_reduction <add>, %26, %cst_17 [0] : vector<2x128xf32> to vector<128xf32>
    %28 = vector.shape_cast %27 : vector<128xf32> to vector<1x128xf32>
    %cst_18 = arith.constant 1.000000e+00 : f32
    %cst_19 = arith.constant 0.000000e+00 : f32
    %29 = vector.broadcast %cst_18 : f32 to vector<2x128xf32>
    %30 = vector.broadcast %cst_19 : f32 to vector<2x128xf32>
    %31 = arith.select %24, %29, %30 : vector<2x128xi1>, vector<2x128xf32>
    %cst_20 = arith.constant dense<0.000000e+00> : vector<128xf32>
    %32 = vector.multi_reduction <add>, %31, %cst_20 [0] : vector<2x128xf32> to vector<128xf32>
    %33 = vector.shape_cast %32 : vector<128xf32> to vector<1x128xf32>
    %34 = arith.mulf %22, %22 : vector<2x128xf32>
    %cst_21 = arith.constant dense<0.000000e+00> : vector<128xf32>
    %35 = vector.multi_reduction <add>, %34, %cst_21 [0] : vector<2x128xf32> to vector<128xf32>
    %36 = vector.shape_cast %35 : vector<128xf32> to vector<1x128xf32>
    %c0_22 = arith.constant 0 : index
    %c2 = arith.constant 2 : index
    %c0_23 = arith.constant 0 : index
    %c0_24 = arith.constant 0 : index
    %37 = vector.load %arg3[%c0_22, %c2, %c0_23, %c0_24] : memref<1x4x2x128xf32, #tpu.memory_space<vmem>>, vector<1x1x2x128xf32>
    %38 = vector.shape_cast %37 : vector<1x1x2x128xf32> to vector<2x128xf32>
    %c2_i32 = arith.constant 2 : i32
    %39 = vector.broadcast %c2_i32 : i32 to vector<2x128xi32>
    %40 = arith.cmpi eq, %4, %39 : vector<2x128xi32>
    %cst_25 = arith.constant 0.000000e+00 : f32
    %41 = vector.broadcast %cst_25 : f32 to vector<2x128xf32>
    %42 = arith.select %40, %38, %41 : vector<2x128xi1>, vector<2x128xf32>
    %cst_26 = arith.constant dense<0.000000e+00> : vector<128xf32>
    %43 = vector.multi_reduction <add>, %42, %cst_26 [0] : vector<2x128xf32> to vector<128xf32>
    %44 = vector.shape_cast %43 : vector<128xf32> to vector<1x128xf32>
    %cst_27 = arith.constant 1.000000e+00 : f32
    %cst_28 = arith.constant 0.000000e+00 : f32
    %45 = vector.broadcast %cst_27 : f32 to vector<2x128xf32>
    %46 = vector.broadcast %cst_28 : f32 to vector<2x128xf32>
    %47 = arith.select %40, %45, %46 : vector<2x128xi1>, vector<2x128xf32>
    %cst_29 = arith.constant dense<0.000000e+00> : vector<128xf32>
    %48 = vector.multi_reduction <add>, %47, %cst_29 [0] : vector<2x128xf32> to vector<128xf32>
    %49 = vector.shape_cast %48 : vector<128xf32> to vector<1x128xf32>
    %50 = arith.mulf %38, %38 : vector<2x128xf32>
    %cst_30 = arith.constant dense<0.000000e+00> : vector<128xf32>
    %51 = vector.multi_reduction <add>, %50, %cst_30 [0] : vector<2x128xf32> to vector<128xf32>
    %52 = vector.shape_cast %51 : vector<128xf32> to vector<1x128xf32>
    %c0_31 = arith.constant 0 : index
    %c3 = arith.constant 3 : index
    %c0_32 = arith.constant 0 : index
    %c0_33 = arith.constant 0 : index
    %53 = vector.load %arg3[%c0_31, %c3, %c0_32, %c0_33] : memref<1x4x2x128xf32, #tpu.memory_space<vmem>>, vector<1x1x2x128xf32>
    %54 = vector.shape_cast %53 : vector<1x1x2x128xf32> to vector<2x128xf32>
    %c3_i32 = arith.constant 3 : i32
    %55 = vector.broadcast %c3_i32 : i32 to vector<2x128xi32>
    %56 = arith.cmpi eq, %4, %55 : vector<2x128xi32>
    %cst_34 = arith.constant 0.000000e+00 : f32
    %57 = vector.broadcast %cst_34 : f32 to vector<2x128xf32>
    %58 = arith.select %56, %54, %57 : vector<2x128xi1>, vector<2x128xf32>
    %cst_35 = arith.constant dense<0.000000e+00> : vector<128xf32>
    %59 = vector.multi_reduction <add>, %58, %cst_35 [0] : vector<2x128xf32> to vector<128xf32>
    %60 = vector.shape_cast %59 : vector<128xf32> to vector<1x128xf32>
    %cst_36 = arith.constant 1.000000e+00 : f32
    %cst_37 = arith.constant 0.000000e+00 : f32
    %61 = vector.broadcast %cst_36 : f32 to vector<2x128xf32>
    %62 = vector.broadcast %cst_37 : f32 to vector<2x128xf32>
    %63 = arith.select %56, %61, %62 : vector<2x128xi1>, vector<2x128xf32>
    %cst_38 = arith.constant dense<0.000000e+00> : vector<128xf32>
    %64 = vector.multi_reduction <add>, %63, %cst_38 [0] : vector<2x128xf32> to vector<128xf32>
    %65 = vector.shape_cast %64 : vector<128xf32> to vector<1x128xf32>
    %66 = arith.mulf %54, %54 : vector<2x128xf32>
    %cst_39 = arith.constant dense<0.000000e+00> : vector<128xf32>
    %67 = vector.multi_reduction <add>, %66, %cst_39 [0] : vector<2x128xf32> to vector<128xf32>
    %68 = vector.shape_cast %67 : vector<128xf32> to vector<1x128xf32>
    %69 = tpu.concatenate %12, %28, %44, %60 in 0 : vector<1x128xf32>, vector<1x128xf32>, vector<1x128xf32>, vector<1x128xf32> -> vector<4x128xf32>
    %70 = tpu.concatenate %17, %33, %49, %65 in 0 : vector<1x128xf32>, vector<1x128xf32>, vector<1x128xf32>, vector<1x128xf32> -> vector<4x128xf32>
    %71 = tpu.concatenate %20, %36, %52, %68 in 0 : vector<1x128xf32>, vector<1x128xf32>, vector<1x128xf32>, vector<1x128xf32> -> vector<4x128xf32>
    %72 = vector.shape_cast %69 : vector<4x128xf32> to vector<1x4x128xf32>
    %73 = vector.shape_cast %70 : vector<4x128xf32> to vector<1x4x128xf32>
    %74 = vector.shape_cast %71 : vector<4x128xf32> to vector<1x4x128xf32>
    %75 = tpu.concatenate %72, %73, %74 in 0 : vector<1x4x128xf32>, vector<1x4x128xf32>, vector<1x4x128xf32> -> vector<3x4x128xf32>
    %c0_40 = arith.constant 0 : index
    %c0_41 = arith.constant 0 : index
    %c0_42 = arith.constant 0 : index
    %c0_43 = arith.constant 0 : index
    %c0_44 = arith.constant 0 : index
    %76 = vector.load %arg5[%c0_40, %c0_41, %c0_42, %c0_43, %c0_44] : memref<1x1x3x4x128xf32, #tpu.memory_space<vmem>>, vector<1x1x3x4x128xf32>
    %77 = vector.shape_cast %76 : vector<1x1x3x4x128xf32> to vector<3x4x128xf32>
    %78 = arith.addf %77, %75 : vector<3x4x128xf32>
    %c0_45 = arith.constant 0 : index
    %c0_46 = arith.constant 0 : index
    %c0_47 = arith.constant 0 : index
    %c0_48 = arith.constant 0 : index
    %c0_49 = arith.constant 0 : index
    %79 = vector.load %arg5[%c0_45, %c0_46, %c0_47, %c0_48, %c0_49] : memref<1x1x3x4x128xf32, #tpu.memory_space<vmem>>, vector<1x1x3x4x128xf32>
    %80 = vector.shape_cast %79 : vector<1x1x3x4x128xf32> to vector<3x4x128xf32>
    %81 = vector.shape_cast %78 : vector<3x4x128xf32> to vector<1x1x3x4x128xf32>
    tpu.vector_store %arg5[%c0_45, %c0_46, %c0_47, %c0_48, %c0_49], %81 {strides = array<i32>} : memref<1x1x3x4x128xf32, #tpu.memory_space<vmem>>, vector<1x1x3x4x128xf32>,
    return
  }
  func.func @transform_0(%arg0: i32, %arg1: i32, %arg2: i32) -> (i32, i32, i32, i32) {
    %c1_i32 = arith.constant 1 : i32
    %0 = arith.muli %arg1, %c1_i32 : i32
    %1 = arith.addi %0, %arg2 : i32
    %c0_i32 = arith.constant 0 : i32
    %c0_i32_0 = arith.constant 0 : i32
    %c0_i32_1 = arith.constant 0 : i32
    return %arg0, %c0_i32, %1, %c0_i32_0 : i32, i32, i32, i32
  }
  func.func @transform_1(%arg0: i32, %arg1: i32, %arg2: i32) -> (i32, i32, i32) {
    %c1_i32 = arith.constant 1 : i32
    %0 = arith.muli %arg1, %c1_i32 : i32
    %1 = arith.addi %0, %arg2 : i32
    %c0_i32 = arith.constant 0 : i32
    %c0_i32_0 = arith.constant 0 : i32
    return %arg0, %1, %c0_i32 : i32, i32, i32
  }
  func.func @transform_2(%arg0: i32, %arg1: i32, %arg2: i32) -> (i32, i32, i32, i32, i32) {
    %c0_i32 = arith.constant 0 : i32
    %c0_i32_0 = arith.constant 0 : i32
    %c0_i32_1 = arith.constant 0 : i32
    %c0_i32_2 = arith.constant 0 : i32
    return %arg0, %arg1, %c0_i32, %c0_i32_0, %c0_i32_1 : i32, i32, i32, i32, i32
  }
}

</mosaic_0001>

<bundles_post_ra>
// kernel: tpu_custom_call.1
= control target key start
LH: loop header
LB: loop body
LE: loop exit
PB: predicated region body
PF: predicated region fallthrough
CT: control target
= control target key end

     0   :  { %7 = vsyncpa [#allocation3], 0  ;;  %s966_s0 = inlined_call_operand.hbm [shape: f32[2,4,2,128], index: 0, kind: input, shape index: {}]   ;;  %s967_s1 = inlined_call_operand.hbm [shape: s32[2,2,128], index: 1, kind: input, shape index: {}]   ;;  %s968_s2 = inlined_call_operand.hbm [shape: f32[2,1,3,4,128], index: 2, kind: output, shape index: {}]  }
   0x1   :  { %9 = vsyncpa [#allocation3 + $0x1], 0 }
   0x2   :  { %10 = vsyncpa [#allocation6], 0 }
   0x3   :  { %12 = vsyncpa [#allocation6 + $0x1], 0 }
   0x4   :  { %13 = vsyncpa [#allocation4], 0 }
   0x5   :  { %15 = vsyncpa [#allocation4 + $0x1], 0  ;;  %s768_s9 = smov 0   ;;  %s770_s10 = smov 0  }
   0x6   :  { %s772_s11 = smov 0   ;;  %s774_s12 = smov 0  }
   0x7   :  { %s776_s13 = smov 0   ;;  %s778_s14 = smov 0  }
   0x8 LB: > { %s507_s15 = sadd.s32 4294967295, %s746_s14   ;;  %s508_s16 = sadd.s32 4294967294, %s746_s14   ;;  %s746_s14 = sphi %s778_s14, %s21_s14   ;;  %s742_s13 = sphi %s776_s13, %s978_s13   ;;  %s738_s12 = sphi %s774_s12, %s977_s12   ;;  %s734_s11 = sphi %s772_s11, %s976_s11   ;;  %s730_s10 = sphi %s770_s10, %s975_s10   ;;  %s726_s9 = sphi %s768_s9, %s974_s9  }
   0x9   : > { %s40_s17 = sadd.s32 1, %s742_s13  ;;  %s51_s18 = sadd.s32 1, %s734_s11 }
   0xa   : > { %p42_p0 = scmp.ge.s32.totalorder %s40_s17, 2  ;;  %p58_p1 = scmp.ne.s32.totalorder %s734_s11, %s730_s10 }
   0xb   : > { %p59_p2 = scmp.eq.s32.totalorder %s746_s14, 0  ;;  %p64_p3 = scmp.ne.s32.totalorder %s730_s10, %s726_s9 }
   0xc   : > { %s980_s17 = smov (%p42_p0, %s40_s17), 0  ;;  %p65_p5 = scmp.eq.s32.totalorder %s507_s15, 0 }
   0xd   : > { %p809_p4 = por %p59_p2, %p58_p1  ;;  %s46_s20 = ssub.s32 %s742_s13, %s980_s17 }
   0xe   : > { %p120_p6 = scmp.eq.s32.totalorder %s507_s15, 1  ;;  %p49_p7 = scmp.eq.s32.totalorder %s46_s20, 0 }
   0xf   : > { %p815_p8 = por %p65_p5, %p64_p3  ;;  %p126_p10 = scmp.eq.s32.totalorder %s508_s16, 1 }
  0x10   : > { %p819_p9 = por %p120_p6, %p58_p1  ;;  %p510_p12 = scmp.ge.s32.totalorder %s746_s14, 2 }
  0x11   : > { %s824_s23 = scalar_select %p49_p7, %s734_s11, %s51_s18  }
  0x12   : > { %p826_p11 = por %p126_p10, %p64_p3  ;;  %p545_p13 = scmp.lt.s32.totalorder %s746_s14, 2 }
  0x13   : > { %s146_s25 = sand.u32 1, %s734_s11   ;;  %s525_s27 = sshll.u32 %s742_s13, 3 }
  0x14   : > { %s511_s26 = sshll.u32 %s146_s25, 3  ;;  %s157_s30 = scalar_lea.hbm %s966_s0, %s525_s27 }
  0x15   : > { %s150_s3 = scalar_lea.vmem [#allocation2], %s511_s26  ;;  %s158_s5 = sshll.u32 %s157_s30, 4  ;;  %s159_s5 = int_to_ptr.hbm [resolvable:$true] %s158_s5 }
  0x16   : > { %s160_s4 = sshll.u32 %s150_s3, 4  ;;  %p839_p0 = pnand %p545_p13, %p809_p4  ;;  %s161_s4 = int_to_ptr.vmem [resolvable:$true] %s160_s4 }
  0x17   : > { %p516_p1 = scmp.ge.s32.totalorder %s746_s14, 1  ;;  %s147_s7 = scalar_lea.sflag [#allocation3], %s146_s25 }
  0x18   : > { %s748_s8 = smov 32   ;;  %s749_s15 = smov 2  }
  0x19   : > { %537 = dma.hbm_to_vmem [thread:$0]  (!%p839_p0), %s159_s5, 128, %s161_s4, %s147_s7, %s748_s8, %s748_s8, %s749_s15  }
  0x1a   : > { %p189_p2 = scmp.lt.s32.totalorder %s746_s14, 3  ;;  %s514_s16 = sshll.u32 %s146_s25, 1 }
  0x1b   : > { %s515_s18 = sshll.u32 %s742_s13, 1  ;;  %s174_s27 = scalar_lea.vmem [#allocation5], %s514_s16 }
  0x1c   : > { %p190_p3 = pnand %p516_p1, %p189_p2  ;;  %s180_s19 = scalar_lea.hbm %s967_s1, %s515_s18 }
  0x1d   : > { %s184_s28 = sshll.u32 %s174_s27, 4  ;;  %s182_s29 = sshll.u32 %s180_s19, 4  ;;  %s185_s28 = int_to_ptr.vmem [resolvable:$true] %s184_s28  ;;  %s183_s29 = int_to_ptr.hbm [resolvable:$true] %s182_s29 }
  0x1e   : > { %s171_s30 = scalar_lea.sflag [#allocation6], %s146_s25  ;;  %193 = sbr.rel (%p190_p3) target bundleno = 83 (0x53), region = 28 }
  0x1f   : > { %540 = dma.hbm_to_vmem [thread:$0]  (!%p839_p0), %s183_s29, 32, %s185_s28, %s171_s30  }
  0x20   : > { %s854_s3 = sand.u32 (!%p190_p3), 1, %s730_s10  }
  0x21   : > { %s517_s4 = sshll.u32 (!%p190_p3), %s854_s3, 3  ;;  %s196_s5 = scalar_lea.sflag (!%p190_p3), [#allocation3], %s854_s3 }
  0x22   : > { %s199_s7 = scalar_lea.vmem (!%p190_p3), [#allocation2], %s517_s4 }
  0x23   : > { %713 = dma.done.wait (%p815_p8), %s196_s5, 128  }
  0x24   : > { %715 = vsyncadd (%p815_p8), %s196_s5, 4294967168  ;;  %s518_s25 = sshll.u32 %s854_s3, 1  ;;  %s206_s6 = scalar_lea.sflag [#allocation6], %s854_s3 }
  0x25   : > { %s209_s8 = scalar_lea.vmem [#allocation5], %s518_s25 }
  0x26   : > { %717 = dma.done.wait (%p815_p8), %s206_s6, 32  }
  0x27   : > { %719 = vsyncadd (%p815_p8), %s206_s6, 4294967264  ;;  %s526_s15 = smul.u32 12, %s854_s3  ;;  %v750_v0 = vmov 0.0   ;;  %vm249_vm0 = vcmask 1041408   ;;  %v245_v1 = vld [vmem:[%s209_s8] sm:$0x3] }
  0x28   : > { %v874_v2 = vld [vmem:[%s199_s7] sm:$0x3]  ;;  %v876_v3 = vld [vmem:[%s199_s7 + $0x2] sm:$0x3]  ;;  %vm247_vm1 = vcmp.eq.s32.totalorder %v245_v1, 0  ;;  %vm275_vm2 = vcmp.eq.s32.totalorder %v245_v1, 1 }
  0x29   : > { %s869_s16 = scalar_lea.vmem [#allocation7], %s526_s15  ;;  %v878_v4 = vld [vmem:[%s199_s7 + $0x4] sm:$0x3]  ;;  %vm302_vm3 = vcmp.eq.s32.totalorder %v245_v1, 2  ;;  %vm329_vm4 = vcmp.eq.s32.totalorder %v245_v1, 3  ;;  %v248_v5 = vsel %vm247_vm1, %v874_v2, 0.0  ;;  %v265_v1 = vmul.f32 %v874_v2, %v874_v2 }
  0x2a   : > { %242 = vst [vmem:[%s869_s16] sm:$0xf] %v750_v0  ;;  %v276_v6 = vsel %vm275_vm2, %v876_v3, 0.0  ;;  %v303_v7 = vsel %vm302_vm3, %v878_v4, 0.0  ;;  %v885_v8 = vld [vmem:[%s199_s7 + $0x6] sm:$0x3]  ;;  %v257_v9 = vsel %vm247_vm1, 1.0, %v750_v0 }
  0x2b   : > { %243 = vst [vmem:[%s869_s16 + $0x4] sm:$0xf] %v750_v0  ;;  %v250_v10 = vsel %vm249_vm0, %v248_v5, 0.0  ;;  %v277_v11 = vsel %vm249_vm0, %v276_v6, 0.0  ;;  %v304_v12 = vsel %vm249_vm0, %v303_v7, 0.0  ;;  %v330_v13 = vsel %vm329_vm4, %v885_v8, 0.0 }
  0x2c   : > { %244 = vst [vmem:[%s869_s16 + $0x8] sm:$0xf] %v750_v0  ;;  %v251_v14 = vrot.slane %v250_v10, 4  ;;  %v278_v15 = vrot.slane %v277_v11, 4  ;;  %v305_v16 = vrot.slane %v304_v12, 4  ;;  %v331_v17 = vsel %vm249_vm0, %v330_v13, 0.0 }
  0x2d   : > { %v332_v18 = vrot.slane %v331_v17, 4  ;;  %vm354_vm5 = vcmask 1040384   ;;  %v258_v19 = vsel %vm249_vm0, %v257_v9, 0.0  ;;  %v284_v20 = vsel %vm275_vm2, 1.0, %v750_v0  ;;  %s527_s21 = smul.u32 12, %s738_s12  ;;  %s389_s12 = sshll.u32 %s869_s16, 4  ;;  %s390_s12 = int_to_ptr.vmem [resolvable:$true] %s389_s12 }
  0x2e   : > { %v311_v21 = vsel %vm302_vm3, 1.0, %v750_v0  ;;  %v252_v22 = vadd.f32 %v251_v14, %v250_v10  ;;  %v279_v23 = vadd.f32 %v278_v15, %v277_v11  ;;  %v306_v24 = vadd.f32 %v305_v16, %v304_v12  ;;  %s375_s27 = scalar_lea.sflag [#allocation4], %s854_s3  ;;  %s680_s5 = scalar_lea.hbm %s968_s2, 24 }
  0x2f   : > { %v259_v25 = vrot.slane %v258_v19, 4  ;;  %v333_v26 = vadd.f32 %v332_v18, %v331_v17  ;;  %vm357_vm6 = vcmask 1042432   ;;  %v285_v27 = vsel %vm249_vm0, %v284_v20, 0.0  ;;  %s388_s26 = scalar_lea.hbm %s968_s2, %s527_s21 }
  0x30   : > { %v312_v28 = vsel %vm249_vm0, %v311_v21, 0.0  ;;  %v338_v29 = vsel %vm329_vm4, 1.0, %v750_v0  ;;  %v253_v30 = vrot.slane %v252_v22, 2  ;;  %v280_v31 = vrot.slane %v279_v23, 2  ;;  %s391_s19 = sshll.u32 %s388_s26, 4  ;;  %s392_s19 = int_to_ptr.hbm [resolvable:$true] %s391_s19 }
  0x31   : > { %v307_v32 = vrot.slane %v306_v24, 2  ;;  %v260_v33 = vadd.f32 %v259_v25, %v258_v19  ;;  %v334_v34 = vrot.slane %v333_v26, 2  ;;  %v286_v35 = vrot.slane %v285_v27, 4  ;;  %v365_v63 = vld [vmem:[%s869_s16] sm:$0xf]  ;;  %s674_s28 = sshra.s32 %s392_s19, 4  ;;  %s675_s28 = int_to_ptr.hbm [resolvable:$true] %s674_s28 }
  0x32   : > { %v313_v36 = vrot.slane %v312_v28, 4  ;;  %v339_v37 = vsel %vm249_vm0, %v338_v29, 0.0  ;;  %v254_v38 = vadd.f32 %v253_v30, %v252_v22  ;;  %v281_v39 = vadd.f32 %v280_v31, %v279_v23  ;;  %v366_v23 = vld [vmem:[%s869_s16 + $0x4] sm:$0xf]  ;;  %s676_s29 = scalar_lea.hbm %s675_s28, 12  ;;  %p681_p7 = scmp.lt.s32.totalorder %s675_s28, %s968_s2 }
  0x33   : > { %v308_v40 = vadd.f32 %v307_v32, %v306_v24  ;;  %v261_v41 = vrot.slane %v260_v33, 2  ;;  %v335_v42 = vadd.f32 %v334_v34, %v333_v26  ;;  %v287_v43 = vadd.f32 %v286_v35, %v285_v27  ;;  %p677_p4 = scmp.ne.s32.totalorder %s675_s28, %s676_s29  ;;  %p682_p8 = scmp.lt.s32.totalorder %s680_s5, %s676_s29 }
  0x34   : > { %v314_v44 = vadd.f32 %v313_v36, %v312_v28  ;;  %v340_v45 = vrot.slane %v339_v37, 4  ;;  %v255_v46 = vrot.slane %v254_v38, 1  ;;  %v282_v47 = vrot.slane %v281_v39, 1 }
  0x35   : > { %v309_v48 = vrot.slane %v308_v40, 1  ;;  %v262_v49 = vadd.f32 %v261_v41, %v260_v33  ;;  %v336_v50 = vrot.slane %v335_v42, 1  ;;  %v288_v51 = vrot.slane %v287_v43, 2  ;;  %p678_p5 = pnand %p677_p4, %p819_p9  ;;  %p683_p10 = por %p682_p8, %p681_p7 }
  0x36   : > { %v315_v52 = vrot.slane %v314_v44, 2  ;;  %v341_v53 = vadd.f32 %v340_v45, %v339_v37  ;;  %v256_v54 = vadd.f32 %v255_v46, %v254_v38  ;;  %v283_v55 = vadd.f32 %v282_v47, %v281_v39 }
  0x37   : > { %v310_v56 = vadd.f32 %v309_v48, %v308_v40  ;;  %v263_v57 = vrot.slane %v262_v49, 1  ;;  %v337_v58 = vadd.f32 %v336_v50, %v335_v42  ;;  %v289_v59 = vadd.f32 %v288_v51, %v287_v43  ;;  %v367_v50 = vld [vmem:[%s869_s16 + $0x8] sm:$0xf]  ;;  %p679_p6 = pneg %p678_p5 }
  0x38   : > { %v316_v60 = vadd.f32 %v315_v52, %v314_v44  ;;  %v342_v61 = vrot.slane %v341_v53, 2  ;;  %v355_v62 = vsel %vm354_vm5, %v256_v54, %v283_v55  ;;  %v292_v5 = vmul.f32 %v876_v3, %v876_v3 }
  0x39   : > { %v264_v0 = vadd.f32 %v263_v57, %v262_v49  ;;  %v356_v6 = vsel %vm249_vm0, %v355_v62, %v310_v56  ;;  %v290_v7 = vrot.slane %v289_v59, 1  ;;  %v266_v12 = vsel %vm249_vm0, %v265_v1, 0.0  ;;  %p684_p13 = pnand %p683_p10, %p679_p6 }
  0x3a   : > { %v317_v9 = vrot.slane %v316_v60, 1  ;;  %v343_v10 = vadd.f32 %v342_v61, %v341_v53  ;;  %v358_v11 = vsel %vm357_vm6, %v356_v6, %v337_v58  ;;  %v293_v13 = vsel %vm249_vm0, %v292_v5, 0.0 }
  0x3b   : > { %v319_v14 = vmul.f32 %v878_v4, %v878_v4  ;;  %v368_v2 = vadd.f32 %v365_v63, %v358_v11  ;;  %v291_v15 = vadd.f32 %v290_v7, %v289_v59  ;;  %v267_v17 = vrot.slane %v266_v12, 4 }
  0x3c   : > { %v318_v16 = vadd.f32 %v317_v9, %v316_v60  ;;  %v344_v3 = vrot.slane %v343_v10, 1  ;;  %v294_v18 = vrot.slane %v293_v13, 4  ;;  %v346_v20 = vmul.f32 %v885_v8, %v885_v8 }
  0x3d   : > { %v320_v19 = vsel %vm249_vm0, %v319_v14, 0.0  ;;  %371 = vst [vmem:[%s869_s16] sm:$0xf] %v368_v2  ;;  %v359_v22 = vsel %vm354_vm5, %v264_v0, %v291_v15  ;;  %v268_v25 = vadd.f32 %v267_v17, %v266_v12 }
  0x3e   : > { %v345_v21 = vadd.f32 %v344_v3, %v343_v10  ;;  %v321_v24 = vrot.slane %v320_v19, 4  ;;  %v360_v4 = vsel %vm249_vm0, %v359_v22, %v318_v16  ;;  %v295_v26 = vadd.f32 %v294_v18, %v293_v13 }
  0x3f   : > { %v347_v27 = vsel %vm249_vm0, %v346_v20, 0.0  ;;  %v269_v8 = vrot.slane %v268_v25, 2 }
  0x40   : > { %v361_v28 = vsel %vm357_vm6, %v360_v4, %v345_v21  ;;  %v322_v29 = vadd.f32 %v321_v24, %v320_v19  ;;  %v348_v30 = vrot.slane %v347_v27, 4  ;;  %v296_v32 = vrot.slane %v295_v26, 2 }
  0x41   : > { %v369_v31 = vadd.f32 %v366_v23, %v361_v28  ;;  %v270_v35 = vadd.f32 %v269_v8, %v268_v25 }
  0x42   : > { %v323_v33 = vrot.slane %v322_v29, 2  ;;  %v349_v34 = vadd.f32 %v348_v30, %v347_v27  ;;  %v297_v36 = vadd.f32 %v296_v32, %v295_v26 }
  0x43   : > { %372 = vst [vmem:[%s869_s16 + $0x4] sm:$0xf] %v369_v31  ;;  %v271_v39 = vrot.slane %v270_v35, 1 }
  0x44   : > { %v324_v37 = vadd.f32 %v323_v33, %v322_v29  ;;  %v350_v38 = vrot.slane %v349_v34, 2  ;;  %v298_v40 = vrot.slane %v297_v36, 1 }
  0x45   : > { %v272_v43 = vadd.f32 %v271_v39, %v270_v35 }
  0x46   : > { %v325_v41 = vrot.slane %v324_v37, 1  ;;  %v351_v42 = vadd.f32 %v350_v38, %v349_v34  ;;  %v299_v44 = vadd.f32 %v298_v40, %v297_v36 }
  0x48   : > { %v326_v45 = vadd.f32 %v325_v41, %v324_v37  ;;  %v352_v46 = vrot.slane %v351_v42, 1  ;;  %v362_v47 = vsel %vm354_vm5, %v272_v43, %v299_v44 }
  0x4a   : > { %v353_v48 = vadd.f32 %v352_v46, %v351_v42  ;;  %v363_v49 = vsel %vm249_vm0, %v362_v47, %v326_v45 }
  0x4c   : > { %v364_v51 = vsel %vm357_vm6, %v363_v49, %v353_v48 }
  0x4d   : > { %v370_v52 = vadd.f32 %v367_v50, %v364_v51 }
  0x4f   : > { %373 = vst [vmem:[%s869_s16 + $0x8] sm:$0xf] %v370_v52 }
  0x50   : > { %687 = shalt.err (!%p684_p13)
}
  0x51   : > { %s751_s3 = smov 64   ;;  %s752_s6 = smov 4  }
  0x52   : > { %532 = dma.vmem_to_hbm [thread:$0]  (%p819_p9), %s390_s12, 192, %s392_s19, %s375_s27, %s751_s3, %s751_s3, %s752_s6  }
  0x53 PF: > { %s406_s8 = sand.u32 1, %s726_s9   ;;  %p542_p0 = pnand %p510_p12, %p826_p11 }
  0x54   : > { %s407_s15 = scalar_lea.sflag [#allocation4], %s406_s8 }
  0x55   : > { %p543_p1 = pneg %p542_p0 }
  0x57   : > { %721 = dma.done.wait (%p543_p1), %s407_s15, 192  }
  0x58   : > { %723 = vsyncadd (%p543_p1), %s407_s15, 4294967104  ;;  %s21_s14 = sadd.s32 1, %s746_s14   ;;  %s974_s9 = smov %s730_s10 }
  0x59   : > { %p18_p2 = scmp.ge.s32.totalorder %s21_s14, 4   ;;  %s975_s10 = smov %s734_s11 }
  0x5a   : > { %s976_s11 = smov %s824_s23  ;;  %s977_s12 = smov %s742_s13 }
  0x5b   : > { %s978_s13 = smov %s980_s17  ;;  %20 = sbr.rel (!%p18_p2) target bundleno = 8 (0x8), region = 93 }
  0x60   :  { %413 = vsyncpa [#allocation3], 1 }
  0x61   :  { %415 = vsyncpa [#allocation3 + $0x1], 1 }
  0x62   :  { %416 = vsyncpa [#allocation6], 1 }
  0x63   :  { %418 = vsyncpa [#allocation6 + $0x1], 1 }
  0x64   :  { %419 = vsyncpa [#allocation4], 1 }
  0x65   :  { %421 = vsyncpa [#allocation4 + $0x1], 1 }

</bundles_post_ra>
